<compile_context>
chip_gen: v7x
topology: tpu7x:2x2x1
jax: 0.10.0
libtpu: 0.0.40
codegen_flags: <defaults>
</compile_context>

<pallas_src>
import functools

import numpy as np
import jax
import jax.numpy as jnp
from jax.experimental import pallas as pl
from jax.experimental.pallas import tpu as pltpu


# ---------------------------------------------------------------------------
# Host-side: 1-D bicubic interpolation matrix (PyTorch semantics), cached.
# ---------------------------------------------------------------------------
@functools.lru_cache(maxsize=None)
def _bicubic_matrix(in_size: int, out_size: int, a: float = -0.75) -> np.ndarray:
    """Interpolation matrix M (out_size, in_size) such that out = M @ in.

    Matches torch.nn.functional.interpolate(mode='bicubic',
    align_corners=False): source coord = (dst + 0.5) * (in/out) - 0.5,
    Keys cubic kernel with A = -0.75, border replicate via index clamping.
    """
    scale = in_size / out_size

    def cc1(x):  # |x| <= 1
        return ((a + 2.0) * x - (a + 3.0)) * x * x + 1.0

    def cc2(x):  # 1 < |x| < 2
        return ((a * x - 5.0 * a) * x + 8.0 * a) * x - 4.0 * a

    m = np.zeros((out_size, in_size), dtype=np.float64)
    for o in range(out_size):
        src = (o + 0.5) * scale - 0.5
        i0 = int(np.floor(src))
        t = src - i0
        coeffs = (cc2(t + 1.0), cc1(t), cc1(1.0 - t), cc2(2.0 - t))
        for k in range(4):
            idx = min(max(i0 - 1 + k, 0), in_size - 1)
            m[o, idx] += coeffs[k]
    return m.astype(np.float32)


# ---------------------------------------------------------------------------
# Pallas kernels: B images per grid step, two MXU matmuls (order per shape).
# ---------------------------------------------------------------------------
def _make_bicubic_kernel(use_bf16: bool, h_first: bool):
    cdt = jnp.bfloat16 if use_bf16 else jnp.float32

    if h_first:
        # Cheaper when H >= W: batched H-direction first, merged W-direction
        # second (the merged matmul produces the output block directly).
        def kernel(wh_ref, wwt_ref, x_ref, o_ref):
            b, h, w = x_ref.shape            # (B, H, W)
            hs = wh_ref.shape[0]             # H * upscale

            x = x_ref[...].astype(cdt)       # (B, H, W)
            wh = wh_ref[...]                 # (Hs, H)
            wwt = wwt_ref[...]               # (W, Ws)

            whb = jnp.broadcast_to(wh[None, :, :], (b, hs, h))
            t = jax.lax.dot_general(
                whb, x,
                dimension_numbers=(((2,), (1,)), ((0,), (0,))),
                preferred_element_type=jnp.float32)          # (B, Hs, W) f32

            t2 = t.reshape(b * hs, w).astype(cdt)            # (B*Hs, W)
            out = jnp.dot(t2, wwt,
                          preferred_element_type=jnp.float32)  # (B*Hs, Ws)
            o_ref[...] = out.astype(o_ref.dtype)
    else:
        # Cheaper when W > H: merged W-direction first, batched H-direction
        # second.
        def kernel(wh_ref, wwt_ref, x_ref, o_ref):
            b, h, w = x_ref.shape            # (B, H, W)
            hs = wh_ref.shape[0]             # H * upscale
            ws = wwt_ref.shape[1]            # W * upscale

            x = x_ref[...].astype(cdt)       # (B, H, W)
            wh = wh_ref[...]                 # (Hs, H)
            wwt = wwt_ref[...]               # (W, Ws)

            t = jnp.dot(x.reshape(b * h, w), wwt,
                        preferred_element_type=jnp.float32)  # (B*H, Ws) f32
            t3 = t.reshape(b, h, ws).astype(cdt)             # (B, H, Ws)

            whb = jnp.broadcast_to(wh[None, :, :], (b, hs, h))
            out = jax.lax.dot_general(
                whb, t3,
                dimension_numbers=(((2,), (1,)), ((0,), (0,))),
                preferred_element_type=jnp.float32)          # (B, Hs, Ws)
            o_ref[...] = out.reshape(b * hs, ws).astype(o_ref.dtype)

    return kernel


def _pick_image_batch(nc: int, h: int, w: int, hs: int, ws: int,
                      vmem_budget: int = 24 * 1024 * 1024) -> int:
    """Number of (n, c) images to process per grid step."""
    # Target M >= 256 rows on the merged output matmul (M = B*Hs).
    b = max(1, -(-256 // hs))
    # Keep >= 2 grid steps when we have >= 2 images so the "parallel" image
    # axis can be split across TensorCores (megacore / v7x).
    if nc >= 2:
        b = min(b, -(-nc // 2))
    b = max(1, min(b, nc))

    def step_bytes(bb):
        # f32 upper bound: double-buffered in/out blocks, double-buffered
        # weights, broadcast Wh + intermediates + output values.
        return 4 * (2 * bb * h * w + 2 * bb * hs * ws
                    + 2 * (hs * h + w * ws)
                    + bb * hs * (h + w + ws) + bb * h * ws)

    while b > 1 and step_bytes(b) > vmem_budget:
        b -= 1
    return b


def bicubic_interpolation_sr(x: jax.Array, upscale: int = 4,
                             use_bf16_mxu: bool = False) -> jax.Array:
    """Forward pass of BicubicInterpolationSR.

    Args:
        x: (N, C, H, W) float array (NCHW, like the PyTorch module).
        upscale: integer upscale factor (> 1).
        use_bf16_mxu: opt-in bf16 weights/activations (f32 accumulation) for
            full-rate MXU on v6e/v7x; loosens agreement with PyTorch to ~1e-2.

    Returns:
        (N, C, H*upscale, W*upscale) array, same dtype as x.
    """
    if int(upscale) != upscale or upscale <= 1:
        raise ValueError("upscale must be an integer > 1")
    n, c, h, w = x.shape
    hs, ws = h * upscale, w * upscale
    nc = n * c

    # Pick the cheaper separable order: per-image FLOPs are proportional to
    # (H + s*W) when applying the H direction first, (W + s*H) otherwise.
    h_first = h >= w

    # TODO(synk): for very large images (H, W >= 256) exploit the 4-tap band
    #   structure of Wh/Ww with spatially tiled, K-windowed BlockSpecs instead
    #   of dense interpolation matrices.
    wdt = jnp.bfloat16 if use_bf16_mxu else jnp.float32
    wh = jnp.asarray(_bicubic_matrix(h, hs), dtype=wdt)        # (Hs, H)
    wwt = jnp.asarray(_bicubic_matrix(w, ws).T, dtype=wdt)     # (W, Ws)

    b = _pick_image_batch(nc, h, w, hs, ws)
    grid = -(-nc // b)
    nc_pad = grid * b

    x3 = x.reshape(nc, h, w)
    if nc_pad != nc:
        x3 = jnp.pad(x3, ((0, nc_pad - nc), (0, 0), (0, 0)))

    if h_first:
        flops = 2 * nc_pad * (hs * h * w + hs * w * ws)
    else:
        flops = 2 * nc_pad * (h * w * ws + hs * h * ws)
    itemsize = np.dtype(x.dtype).itemsize
    cost = pl.CostEstimate(
        flops=int(flops),
        transcendentals=0,
        bytes_accessed=int(itemsize * (nc_pad * h * w + nc_pad * hs * ws)
                           + np.dtype(wdt).itemsize * (hs * h + w * ws)),
    )

    out2d = pl.pallas_call(
        _make_bicubic_kernel(use_bf16_mxu, h_first),
        out_shape=jax.ShapeDtypeStruct((nc_pad * hs, ws), x.dtype),
        grid_spec=pltpu.PrefetchScalarGridSpec(
            num_scalar_prefetch=0,
            grid=(grid,),
            in_specs=[
                # Interpolation matrices: constant block index -> fetched once
                # and resident in VMEM across all grid steps (KB-sized).
                pl.BlockSpec((hs, h), lambda g: (0, 0)),      # Wh   (shared)
                pl.BlockSpec((w, ws), lambda g: (0, 0)),      # Ww^T (shared)
                # B images per grid step.
                pl.BlockSpec((b, h, w), lambda g: (g, 0, 0)),
            ],
            # (B*Hs, Ws) block: reshapes back to (N, C, Hs, Ws) with no
            # transpose; lane-dense whenever Ws = W*upscale >= 128.
            out_specs=pl.BlockSpec((b * hs, ws), lambda g: (g, 0)),
        ),
        compiler_params=pltpu.CompilerParams(
            dimension_semantics=("parallel",),
            vmem_limit_bytes=32 * 1024 * 1024,
        ),
        cost_estimate=cost,
    )(wh, wwt, x3)

    if nc_pad != nc:
        out2d = out2d[: nc * hs]
    return out2d.reshape(n, c, hs, ws)


def _reference(x, upscale):
    """Pure-JAX reference using the same separable interpolation matrices."""
    _, _, h, w = x.shape
    wh = jnp.asarray(_bicubic_matrix(h, h * upscale))
    ww = jnp.asarray(_bicubic_matrix(w, w * upscale))
    return jnp.einsum('ph,nchw,qw->ncpq', wh, x, ww)


if __name__ == "__main__":
    key = jax.random.PRNGKey(0)

    # --- Module defaults: num_in_ch = num_out_ch = 3, upscale = 4 (square,
    # exercises the H-first path). -------------------------------------------
    N, C, H, W = 2, 3, 16, 16
    upscale = 4
    x = jax.random.normal(key, (N, C, H, W), dtype=jnp.float32)

    out = jax.block_until_ready(bicubic_interpolation_sr(x, upscale=upscale))
    assert out.shape == (N, C, H * upscale, W * upscale), out.shape
    assert out.dtype == x.dtype
    np.testing.assert_allclose(np.asarray(out), np.asarray(_reference(x, upscale)),
                               rtol=5e-5, atol=5e-5)

    # Opt-in bf16 MXU fast path (f32 accumulation), looser tolerance.
    out_bf16 = jax.block_until_ready(
        bicubic_interpolation_sr(x, upscale=upscale, use_bf16_mxu=True))
    np.testing.assert_allclose(np.asarray(out_bf16),
                               np.asarray(_reference(x, upscale)),
                               rtol=5e-2, atol=1e-1)

    # --- Non-square input (W > H): exercises the W-first matmul order. ------
    N2, C2, H2, W2, up2 = 1, 3, 8, 24, 2
    x2 = jax.random.normal(jax.random.PRNGKey(1), (N2, C2, H2, W2),
                           dtype=jnp.float32)
    out2 = jax.block_until_ready(bicubic_interpolation_sr(x2, upscale=up2))
    assert out2.shape == (N2, C2, H2 * up2, W2 * up2), out2.shape
    np.testing.assert_allclose(np.asarray(out2), np.asarray(_reference(x2, up2)),
                               rtol=5e-5, atol=5e-5)

    print("KERNEL_OK")
</pallas_src>

<mosaic_0001>
module attributes {stable_mosaic.version = 11 : i64} {
  func.func @kernel(%arg0: i32, %arg1: memref<64x16xf32, #tpu.memory_space<vmem>>, %arg2: memref<16x64xf32, #tpu.memory_space<vmem>>, %arg3: memref<3x16x16xf32, #tpu.memory_space<vmem>>, %arg4: memref<192x64xf32, #tpu.memory_space<vmem>>) attributes {dimension_semantics = [#tpu.dimension_semantics<parallel>], iteration_bounds = array<i64: 2>, scalar_prefetch = 0 : i64, scratch_operands = 0 : i64, tpu.core_type = #tpu.core_type<tc>, window_params = [{pipeline_mode = #tpu.pipeline_mode<synchronous>, transform_indices = @transform_0, window_bounds = array<i64: 64, 16>}, {pipeline_mode = #tpu.pipeline_mode<synchronous>, transform_indices = @transform_1, window_bounds = array<i64: 16, 64>}, {transform_indices = @transform_2, window_bounds = array<i64: 3, 16, 16>}, {transform_indices = @transform_3, window_bounds = array<i64: 192, 64>}]} {
    %c0 = arith.constant 0 : index
    %c0_0 = arith.constant 0 : index
    %c0_1 = arith.constant 0 : index
    %0 = vector.load %arg3[%c0, %c0_0, %c0_1] : memref<3x16x16xf32, #tpu.memory_space<vmem>>, vector<3x16x16xf32>
    %c0_2 = arith.constant 0 : index
    %c0_3 = arith.constant 0 : index
    %1 = vector.load %arg1[%c0_2, %c0_3] : memref<64x16xf32, #tpu.memory_space<vmem>>, vector<64x16xf32>
    %c0_4 = arith.constant 0 : index
    %c0_5 = arith.constant 0 : index
    %2 = vector.load %arg2[%c0_4, %c0_5] : memref<16x64xf32, #tpu.memory_space<vmem>>, vector<16x64xf32>
    %3 = vector.shape_cast %1 : vector<64x16xf32> to vector<1x64x16xf32>
    %4 = vector.shape_cast %3 : vector<1x64x16xf32> to vector<1x64x16xf32>
    %5 = vector.broadcast %4 : vector<1x64x16xf32> to vector<3x64x16xf32>
    %cst = arith.constant dense<0.000000e+00> : vector<3x64x16xf32>
    %6 = tpu.matmul %5, %0, %cst {dimension_numbers = #tpu.dot_dimension_numbers<[2], [1], [1], [2], [0, 0, 0, 1, 1, 2], [0], [0]>} : vector<3x64x16xf32>, vector<3x16x16xf32>, vector<3x64x16xf32> -> vector<3x64x16xf32>
    %7 = vector.shape_cast %6 : vector<3x64x16xf32> to vector<192x16xf32>
    %cst_6 = arith.constant dense<0.000000e+00> : vector<192x64xf32>
    %8 = tpu.matmul %7, %2, %cst_6 {dimension_numbers = #tpu.dot_dimension_numbers<[1], [0], [0], [1], [0, 0, 1, 1], [], []>} : vector<192x16xf32>, vector<16x64xf32>, vector<192x64xf32> -> vector<192x64xf32>
    %c0_7 = arith.constant 0 : index
    %c0_8 = arith.constant 0 : index
    %9 = vector.load %arg4[%c0_7, %c0_8] : memref<192x64xf32, #tpu.memory_space<vmem>>, vector<192x64xf32>
    tpu.vector_store %arg4[%c0_7, %c0_8], %8 {strides = array<i32>} : memref<192x64xf32, #tpu.memory_space<vmem>>, vector<192x64xf32>,
    return
  }
  func.func @transform_0(%arg0: i32) -> (i32, i32) {
    %c0_i32 = arith.constant 0 : i32
    %c0_i32_0 = arith.constant 0 : i32
    %c0_i32_1 = arith.constant 0 : i32
    return %c0_i32, %c0_i32_0 : i32, i32
  }
  func.func @transform_1(%arg0: i32) -> (i32, i32) {
    %c0_i32 = arith.constant 0 : i32
    %c0_i32_0 = arith.constant 0 : i32
    %c0_i32_1 = arith.constant 0 : i32
    return %c0_i32, %c0_i32_0 : i32, i32
  }
  func.func @transform_2(%arg0: i32) -> (i32, i32, i32) {
    %c0_i32 = arith.constant 0 : i32
    %c0_i32_0 = arith.constant 0 : i32
    %c0_i32_1 = arith.constant 0 : i32
    return %arg0, %c0_i32, %c0_i32_0 : i32, i32, i32
  }
  func.func @transform_3(%arg0: i32) -> (i32, i32) {
    %c0_i32 = arith.constant 0 : i32
    %c0_i32_0 = arith.constant 0 : i32
    return %arg0, %c0_i32 : i32, i32
  }
}

</mosaic_0001>

<bundles_post_ra>
// kernel: tpu_custom_call.1
= control target key start
LH: loop header
LB: loop body
LE: loop exit
PB: predicated region body
PF: predicated region fallthrough
CT: control target
= control target key end

     0   :  { %8 = vsyncpa [#allocation3], 0  ;;  %s1487_s0 = inlined_call_operand.vmem [shape: f32[64,16], index: 0, kind: input, shape index: {}]   ;;  %s1488_s1 = inlined_call_operand.vmem [shape: f32[16,64], index: 1, kind: input, shape index: {}]   ;;  %s1489_s2 = inlined_call_operand.hbm [shape: f32[6,16,16], index: 2, kind: input, shape index: {}]   ;;  %s1490_s3 = inlined_call_operand.vmem [shape: f32[384,64], index: 3, kind: output, shape index: {}]  }
   0x1   :  { %10 = vsyncpa [#allocation3 + $0x1], 0  ;;  %s1252_s12 = smov 0   ;;  %s1254_s13 = smov 0  }
   0x2   :  { %s1256_s14 = smov 0   ;;  %s1258_s15 = smov 0  }
   0x3 LB: > { %s899_s16 = sadd.s32 4294967295, %s1227_s15   ;;  %s1272_s17 = sadd.s32 1, %s1227_s15   ;;  %s1227_s15 = sphi %s1258_s15, %s1497_s15   ;;  %s1223_s14 = sphi %s1256_s14, %s1496_s14   ;;  %s1219_s13 = sphi %s1254_s13, %s1495_s13   ;;  %s1215_s12 = sphi %s1252_s12, %s1494_s12  }
   0x4   : > { %s62_s18 = ssub.s32 %s1227_s15, %s1272_s17  ;;  %s65_s19 = sadd.s32 1, %s1223_s14 }
   0x5   : > { %p63_p0 = scmp.eq.s32.totalorder %s62_s18, 0  ;;  %p72_p1 = scmp.ne.s32.totalorder %s1223_s14, %s1219_s13 }
   0x6   : > { %p73_p2 = scmp.eq.s32.totalorder %s1227_s15, 0  ;;  %p78_p3 = scmp.ne.s32.totalorder %s1219_s13, %s1215_s12 }
   0x7   : > { %s1282_s20 = scalar_select %p63_p0, %s1223_s14, %s65_s19  }
   0x8   : > { %p74_p4 = por %p73_p2, %p72_p1  ;;  %p79_p5 = scmp.eq.s32.totalorder %s899_s16, 0 }
   0x9   : > { %p1128_p6 = scmp.lt.s32.totalorder %s1227_s15, 2  ;;  %s134_s22 = sand.u32 1, %s1223_s14  }
   0xa   : > { %p1287_p7 = por %p79_p5, %p78_p3  ;;  %s1120_s23 = smul.u32 48, %s134_s22 }
   0xb   : > { %s959_s24 = smul.u32 768, %s1227_s15  ;;  %p1293_p8 = pnand %p1128_p6, %p74_p4 }
   0xc   : > { %s138_s29 = scalar_lea.vmem [#allocation2], %s1120_s23  ;;  %s1305_s4 = scalar_lea.sflag [#allocation3], %s134_s22 }
   0xd   : > { %s1300_s28 = scalar_lea.hbm %s1489_s2, %s959_s24  ;;  %s146_s30 = sshll.u32 %s138_s29, 4  ;;  %s1302_s30 = int_to_ptr.vmem [resolvable:$true] %s146_s30 }
   0xe   : > { %s1163_s5 = scalar_lea.hbm %s1300_s28, 768  ;;  %p1165_p11 = pneg %p1293_p8 }
   0xf   : > { %p1164_p10 = scmp.ne.s32.totalorder %s1300_s28, %s1163_s5  ;;  %s1168_s8 = scalar_lea.hbm %s1489_s2, 1536 }
  0x10   : > { %p1169_p0 = scmp.lt.u32.totalorder %s1300_s28, %s1489_s2  ;;  %p1170_p1 = scmp.lt.u32.totalorder %s1168_s8, %s1163_s5 }
  0x11   : > { %p1166_p12 = pnand %p1165_p11, %p1164_p10  ;;  %p1172_p3 = scmp.lt.u32.totalorder %s1163_s5, %s1300_s28 }
  0x12   : > { %p1171_p2 = por %p1170_p1, %p1169_p0 }
  0x13   : > { %p1167_p13 = pneg %p1166_p12 }
  0x14   : > { %p1173_p4 = por %p1172_p3, %p1171_p2 }
  0x16   : > { %p1174_p5 = pnand %p1173_p4, %p1167_p13 }
  0x18   : > { %1177 = shalt.err (!%p1174_p5)
}
  0x19   : > { %s1178_s11 = scalar_lea.vmem %s1302_s30, 768  ;;  %s1229_s12 = smov [#allocation2]  }
  0x1a   : > { %p1179_p6 = scmp.ne.s32.totalorder %s1302_s30, %s1178_s11  ;;  %s1183_s18 = sshll.u32 %s1229_s12, 4  ;;  %s1184_s18 = int_to_ptr.vmem [resolvable:$false] %s1183_s18 }
  0x1b   : > { %s1185_s19 = scalar_lea.vmem %s1184_s18, 1536  ;;  %p1186_p9 = scmp.lt.s32.totalorder %s1302_s30, %s1184_s18 }
  0x1c   : > { %p1181_p10 = pnand %p1179_p6, %p1165_p11  ;;  %p1187_p0 = scmp.lt.s32.totalorder %s1185_s19, %s1178_s11 }
  0x1e   : > { %p1182_p12 = pneg %p1181_p10  ;;  %p1188_p1 = por %p1187_p0, %p1186_p9 }
  0x20   : > { %p1189_p2 = pnand %p1188_p1, %p1182_p12 }
  0x22   : > { %1192 = shalt.err (!%p1189_p2)
}
  0x23   : > { %s1230_s22 = smov 128   ;;  %s1231_s23 = smov 8  }
  0x24   : > { %1127 = dma.hbm_to_vmem [thread:$0]  (!%p1293_p8), %s1300_s28, 768, %s1302_s30, %s1305_s4, %s1230_s22, %s1230_s22, %s1231_s23  }
  0x25   : > { %p154_p11 = scmp.lt.s32.totalorder %s1227_s15, 3  ;;  %p1493_p13 = scmp.ge.s32.totalorder %s1227_s15, 1 }
  0x27   : > { %p155_p3 = pnand %p1493_p13, %p154_p11 }
  0x28   : > { %s160_s24 = sand.u32 (!%p155_p3), 1, %s1219_s13  }
  0x29   : > { %158 = sbr.rel (%p155_p3) target bundleno = 528 (0x210), region = 32  ;;  %s161_s27 = scalar_lea.sflag (!%p155_p3), [#allocation3], %s160_s24 }
  0x2a   : > { %s1121_s26 = smul.u32 (!%p155_p3), 48, %s160_s24 }
  0x2c   : > { %s164_s29 = scalar_lea.vmem (!%p155_p3), [#allocation2], %s1121_s26 }
  0x30   : > { %1210 = dma.done.wait (%p1287_p7), %s161_s27, 768  }
  0x31   : > { %1212 = vsyncadd (%p1287_p7), %s161_s27, 4294966528  ;;  %vm210_vm0 = vcmask 130048   ;;  %v194_v0 = vld [vmem:[%s164_s29] sm:$0xff]  ;;  %v195_v1 = vld [vmem:[%s164_s29 + $0x8] sm:$0xff]  ;;  %vm807_vm1 = vcmask 523264  }
  0x32   : > { %v200_v2 = vld [vmem:[%s1487_s0] sm:$0xff]  ;;  %v1104_v3 = vpack.c.bf16 %v195_v1, %v194_v0  ;;  %v197_v5 = vld [vmem:[%s164_s29 + $0x18] sm:$0xff]  ;;  %v199_v9 = vld [vmem:[%s164_s29 + $0x28] sm:$0xff] }
  0x33   : > { %1020 = vmatprep.mubr.msk.f32.mxu0 %vm210_vm0, %v200_v2  ;;  %v196_v4 = vld [vmem:[%s164_s29 + $0x10] sm:$0xff]  ;;  %v201_v7 = vld [vmem:[%s1487_s0 + $0x8] sm:$0xff]  ;;  %v198_v8 = vld [vmem:[%s164_s29 + $0x20] sm:$0xff]  ;;  %s188_s29 = smul.u32 24, %s899_s16 }
  0x34   : > { %v1108_v6 = vpack.c.bf16 %v197_v5, %v196_v4  ;;  %1105 = vmatprep.subr.bf16.mxu0 %v1104_v3  ;;  %v208_v10 = vld [vmem:[%s1488_s1] sm:$0xff]  ;;  %v202_v11 = vld [vmem:[%s1487_s0 + $0x10] sm:$0xff]  ;;  %v1112_v12 = vpack.c.bf16 %v199_v9, %v198_v8  ;;  %v209_v13 = vld [vmem:[%s1488_s1 + $0x8] sm:$0xff] }
  0x35   : > { %1107 = vmatpush3.bf16.msra.mxu0 %v1104_v3  ;;  %v1116_v14 = vpack.c.bf16 %v209_v13, %v208_v10  ;;  %v203_v15 = vld [vmem:[%s1487_s0 + $0x18] sm:$0xff]  ;;  %v204_v16 = vld [vmem:[%s1487_s0 + $0x20] sm:$0xff]  ;;  %v205_v17 = vld [vmem:[%s1487_s0 + $0x28] sm:$0xff]  ;;  %p189_p7 = scmp.lt.s32.totalorder %s188_s29, 47 }
  0x36   : > { %1109 = vmatprep.subr.bf16.mxu0 %v1108_v6  ;;  %v206_v18 = vld [vmem:[%s1487_s0 + $0x30] sm:$0xff]  ;;  %v207_v19 = vld [vmem:[%s1487_s0 + $0x38] sm:$0xff] }
  0x37   : > { %1117 = vmatprep.subr.bf16.mxu1 %v1116_v14  ;;  %s1499_s29 = smov (!%p189_p7, %s188_s29), 47 }
  0x38   : > { %1021 = vmatmul.mubr.msk.f32.vlgmr.msra.gmra.mrb[0].mxu0 %vm210_vm0, %v201_v7  ;;  %1119 = vmatpush3.bf16.msra.mxu1 %v1116_v14  ;;  %s906_s25 = sshll.u32 %s1499_s29, 3 }
  0x39   : > { %1111 = vmatpush3.bf16.msra.mxu0 %v1108_v6  ;;  %1023 = vmatprep.mubr.msk.f32.mxu0 %vm210_vm0, %v202_v11  ;;  %s1424_s4 = scalar_lea.vmem %s1490_s3, %s906_s25 }
  0x3a   : > { %1113 = vmatprep.subr.bf16.mxu0 %v1112_v12 }
  0x3c   : > { %1024 = vmatmul.mubr.msk.f32.gmra.mrb[2].mxu0 %vm210_vm0, %v203_v15 }
  0x3d   : > { %1026 = vmatprep.mubr.msk.f32.mxu0 %vm210_vm0, %v204_v16 }
  0x40   : > { %1027 = vmatmul.mubr.msk.f32.gmra.mrb[4].mxu0 %vm210_vm0, %v205_v17 }
  0x41   : > { %1029 = vmatprep.mubr.msk.f32.mxu0 %vm210_vm0, %v206_v18 }
  0x44   : > { %1030 = vmatmul.mubr.msk.f32.gmra.mrb[6].mxu0 %vm210_vm0, %v207_v19 }
  0x45   : > { %1036 = vmatprep.mubr.msk.f32.mxu0 %vm210_vm0, %v200_v2 }
  0x48   : > { %1037 = vmatmul.mubr.msk.f32.vlgmr.msra.gmra.mrb[8].mxu0 %vm210_vm0, %v201_v7 }
  0x49   : > { %1115 = vmatpush3.bf16.msra.mxu0 %v1112_v12  ;;  %1039 = vmatprep.mubr.msk.f32.mxu0 %vm210_vm0, %v202_v11 }
  0x4c   : > { %1040 = vmatmul.mubr.msk.f32.gmra.mrb[10].mxu0 %vm210_vm0, %v203_v15 }
  0x4d   : > { %1042 = vmatprep.mubr.msk.f32.mxu0 %vm210_vm0, %v204_v16 }
  0x50   : > { %1043 = vmatmul.mubr.msk.f32.gmra.mrb[12].mxu0 %vm210_vm0, %v205_v17 }
  0x51   : > { %1045 = vmatprep.mubr.msk.f32.mxu0 %vm210_vm0, %v206_v18 }
  0x54   : > { %1046 = vmatmul.mubr.msk.f32.gmra.mrb[14].mxu0 %vm210_vm0, %v207_v19 }
  0x55   : > { %1052 = vmatprep.mubr.msk.f32.mxu0 %vm210_vm0, %v200_v2 }
  0x58   : > { %1053 = vmatmul.mubr.msk.f32.vlgmr.msra.gmra.mrb[16].mxu0 %vm210_vm0, %v201_v7 }
  0x59   : > { %1055 = vmatprep.mubr.msk.f32.mxu0 %vm210_vm0, %v202_v11 }
  0x5c   : > { %1056 = vmatmul.mubr.msk.f32.gmra.mrb[18].mxu0 %vm210_vm0, %v203_v15 }
  0x5d   : > { %1058 = vmatprep.mubr.msk.f32.mxu0 %vm210_vm0, %v204_v16 }
  0x60   : > { %1059 = vmatmul.mubr.msk.f32.gmra.mrb[20].mxu0 %vm210_vm0, %v205_v17 }
  0x61   : > { %1061 = vmatprep.mubr.msk.f32.mxu0 %vm210_vm0, %v206_v18 }
  0x64   : > { %1062 = vmatmul.mubr.msk.f32.gmra.mrb[22].mxu0 %vm210_vm0, %v207_v19 }
 0x10b   : > { %v1022_v20 = vpop.f32.mrb[0].mxu0 }
 0x10c   : > { %v301_v21 = vpop.f32.mrb[1].mxu0 }
 0x10d   : > { %1068 = vmatprep.mubr.msk.f32.mxu1 %vm210_vm0, %v301_v21 }
 0x10e   : > { %1069 = vmatmul.mubr.msk.f32.vlgmr.msra.gmra.mrb[0].mxu1 %vm210_vm0, %v1022_v20 }
 0x10f   : > { %v1025_v22 = vpop.f32.mrb[2].mxu0 }
 0x110   : > { %v311_v23 = vpop.f32.mrb[3].mxu0 }
 0x111   : > { %1071 = vmatprep.mubr.msk.f32.mxu1 %vm210_vm0, %v311_v23 }
 0x112   : > { %1072 = vmatmul.mubr.msk.f32.gmra.mrb[2].mxu1 %vm210_vm0, %v1025_v22 }
 0x113   : > { %v1028_v24 = vpop.f32.mrb[4].mxu0 }
 0x114   : > { %v321_v25 = vpop.f32.mrb[5].mxu0 }
 0x115   : > { %1074 = vmatprep.mubr.msk.f32.mxu1 %vm210_vm0, %v321_v25 }
 0x116   : > { %1075 = vmatmul.mubr.msk.f32.gmra.mrb[4].mxu1 %vm210_vm0, %v1028_v24 }
 0x117   : > { %v1031_v26 = vpop.f32.mrb[6].mxu0 }
 0x118   : > { %v331_v27 = vpop.f32.mrb[7].mxu0 }
 0x119   : > { %1077 = vmatprep.mubr.msk.f32.mxu1 %vm210_vm0, %v331_v27 }
 0x11a   : > { %1078 = vmatmul.mubr.msk.f32.gmra.mrb[6].mxu1 %vm210_vm0, %v1031_v26 }
 0x11b   : > { %v1038_v28 = vpop.f32.mrb[8].mxu0 }
 0x11c   : > { %v406_v29 = vpop.f32.mrb[9].mxu0 }
 0x11d   : > { %1080 = vmatprep.mubr.msk.f32.mxu1 %vm210_vm0, %v406_v29 }
 0x11e   : > { %1081 = vmatmul.mubr.msk.f32.gmra.mrb[8].mxu1 %vm210_vm0, %v1038_v28 }
 0x11f   : > { %v1041_v30 = vpop.f32.mrb[10].mxu0 }
 0x120   : > { %v416_v31 = vpop.f32.mrb[11].mxu0 }
 0x121   : > { %1083 = vmatprep.mubr.msk.f32.mxu1 %vm210_vm0, %v416_v31 }
 0x122   : > { %1084 = vmatmul.mubr.msk.f32.gmra.mrb[10].mxu1 %vm210_vm0, %v1041_v30 }
 0x123   : > { %v1044_v32 = vpop.f32.mrb[12].mxu0 }
 0x124   : > { %v426_v33 = vpop.f32.mrb[13].mxu0 }
 0x125   : > { %1086 = vmatprep.mubr.msk.f32.mxu1 %vm210_vm0, %v426_v33 }
 0x126   : > { %1087 = vmatmul.mubr.msk.f32.gmra.mrb[12].mxu1 %vm210_vm0, %v1044_v32 }
 0x127   : > { %v1047_v34 = vpop.f32.mrb[14].mxu0 }
 0x128   : > { %v436_v35 = vpop.f32.mrb[15].mxu0 }
 0x129   : > { %1089 = vmatprep.mubr.msk.f32.mxu1 %vm210_vm0, %v436_v35 }
 0x12a   : > { %1090 = vmatmul.mubr.msk.f32.gmra.mrb[14].mxu1 %vm210_vm0, %v1047_v34 }
 0x12b   : > { %v1054_v36 = vpop.f32.mrb[16].mxu0 }
 0x12c   : > { %v511_v37 = vpop.f32.mrb[17].mxu0 }
 0x12d   : > { %1092 = vmatprep.mubr.msk.f32.mxu1 %vm210_vm0, %v511_v37 }
 0x12e   : > { %1093 = vmatmul.mubr.msk.f32.gmra.mrb[16].mxu1 %vm210_vm0, %v1054_v36 }
 0x12f   : > { %v1057_v38 = vpop.f32.mrb[18].mxu0 }
 0x130   : > { %v521_v39 = vpop.f32.mrb[19].mxu0 }
 0x131   : > { %1095 = vmatprep.mubr.msk.f32.mxu1 %vm210_vm0, %v521_v39 }
 0x132   : > { %1096 = vmatmul.mubr.msk.f32.gmra.mrb[18].mxu1 %vm210_vm0, %v1057_v38 }
 0x133   : > { %v1060_v40 = vpop.f32.mrb[20].mxu0 }
 0x134   : > { %v531_v41 = vpop.f32.mrb[21].mxu0 }
 0x135   : > { %1098 = vmatprep.mubr.msk.f32.mxu1 %vm210_vm0, %v531_v41 }
 0x136   : > { %1099 = vmatmul.mubr.msk.f32.gmra.mrb[20].mxu1 %vm210_vm0, %v1060_v40 }
 0x137   : > { %v1063_v42 = vpop.f32.mrb[22].mxu0 }
 0x138   : > { %v541_v43 = vpop.f32.mrb[23].mxu0 }
 0x139   : > { %1101 = vmatprep.mubr.msk.f32.mxu1 %vm210_vm0, %v541_v43 }
 0x13a   : > { %1102 = vmatmul.mubr.msk.f32.gmra.mrb[22].mxu1 %vm210_vm0, %v1063_v42 }
 0x1e1   : > { %v1070_v44 = vpop.f32.mrb[0].mxu1 }
 0x1e2   : > { %809 = vst.msk [vmem:[%s1424_s4 + $0x8] sm:$0xff] %vm807_vm1, %v1070_v44  ;;  %v688_v45 = vpop.f32.mrb[1].mxu1 }
 0x1e3   : > { %808 = vst.msk [vmem:[%s1424_s4] sm:$0xff] %vm807_vm1, %v688_v45 }
 0x1e5   : > { %v1073_v46 = vpop.f32.mrb[2].mxu1 }
 0x1e6   : > { %811 = vst.msk [vmem:[%s1424_s4 + $0x18] sm:$0xff] %vm807_vm1, %v1073_v46  ;;  %v698_v47 = vpop.f32.mrb[3].mxu1 }
 0x1e7   : > { %810 = vst.msk [vmem:[%s1424_s4 + $0x10] sm:$0xff] %vm807_vm1, %v698_v47 }
 0x1e9   : > { %v1076_v48 = vpop.f32.mrb[4].mxu1 }
 0x1ea   : > { %813 = vst.msk [vmem:[%s1424_s4 + $0x28] sm:$0xff] %vm807_vm1, %v1076_v48  ;;  %v708_v49 = vpop.f32.mrb[5].mxu1 }
 0x1eb   : > { %812 = vst.msk [vmem:[%s1424_s4 + $0x20] sm:$0xff] %vm807_vm1, %v708_v49 }
 0x1ed   : > { %v1079_v50 = vpop.f32.mrb[6].mxu1 }
 0x1ee   : > { %815 = vst.msk [vmem:[%s1424_s4 + $0x38] sm:$0xff] %vm807_vm1, %v1079_v50  ;;  %v718_v51 = vpop.f32.mrb[7].mxu1 }
 0x1ef   : > { %814 = vst.msk [vmem:[%s1424_s4 + $0x30] sm:$0xff] %vm807_vm1, %v718_v51 }
 0x1f1   : > { %v1082_v52 = vpop.f32.mrb[8].mxu1 }
 0x1f2   : > { %817 = vst.msk [vmem:[%s1424_s4 + $0x48] sm:$0xff] %vm807_vm1, %v1082_v52  ;;  %v728_v53 = vpop.f32.mrb[9].mxu1 }
 0x1f3   : > { %816 = vst.msk [vmem:[%s1424_s4 + $0x40] sm:$0xff] %vm807_vm1, %v728_v53 }
 0x1f5   : > { %v1085_v54 = vpop.f32.mrb[10].mxu1 }
 0x1f6   : > { %819 = vst.msk [vmem:[%s1424_s4 + $0x58] sm:$0xff] %vm807_vm1, %v1085_v54  ;;  %v738_v55 = vpop.f32.mrb[11].mxu1 }
 0x1f7   : > { %818 = vst.msk [vmem:[%s1424_s4 + $0x50] sm:$0xff] %vm807_vm1, %v738_v55 }
 0x1f9   : > { %v1088_v56 = vpop.f32.mrb[12].mxu1 }
 0x1fa   : > { %821 = vst.msk [vmem:[%s1424_s4 + $0x68] sm:$0xff] %vm807_vm1, %v1088_v56  ;;  %v748_v57 = vpop.f32.mrb[13].mxu1 }
 0x1fb   : > { %820 = vst.msk [vmem:[%s1424_s4 + $0x60] sm:$0xff] %vm807_vm1, %v748_v57 }
 0x1fd   : > { %v1091_v58 = vpop.f32.mrb[14].mxu1 }
 0x1fe   : > { %823 = vst.msk [vmem:[%s1424_s4 + $0x78] sm:$0xff] %vm807_vm1, %v1091_v58  ;;  %v758_v59 = vpop.f32.mrb[15].mxu1 }
 0x1ff   : > { %822 = vst.msk [vmem:[%s1424_s4 + $0x70] sm:$0xff] %vm807_vm1, %v758_v59 }
 0x201   : > { %v1094_v60 = vpop.f32.mrb[16].mxu1 }
 0x202   : > { %825 = vst.msk [vmem:[%s1424_s4 + $0x88] sm:$0xff] %vm807_vm1, %v1094_v60  ;;  %v768_v61 = vpop.f32.mrb[17].mxu1 }
 0x203   : > { %824 = vst.msk [vmem:[%s1424_s4 + $0x80] sm:$0xff] %vm807_vm1, %v768_v61 }
 0x205   : > { %v1097_v62 = vpop.f32.mrb[18].mxu1 }
 0x206   : > { %827 = vst.msk [vmem:[%s1424_s4 + $0x98] sm:$0xff] %vm807_vm1, %v1097_v62  ;;  %v778_v63 = vpop.f32.mrb[19].mxu1 }
 0x207   : > { %826 = vst.msk [vmem:[%s1424_s4 + $0x90] sm:$0xff] %vm807_vm1, %v778_v63 }
 0x209   : > { %v1100_v0 = vpop.f32.mrb[20].mxu1 }
 0x20a   : > { %829 = vst.msk [vmem:[%s1424_s4 + $0xa8] sm:$0xff] %vm807_vm1, %v1100_v0  ;;  %v788_v1 = vpop.f32.mrb[21].mxu1 }
 0x20b   : > { %828 = vst.msk [vmem:[%s1424_s4 + $0xa0] sm:$0xff] %vm807_vm1, %v788_v1 }
 0x20d   : > { %v1103_v2 = vpop.f32.mrb[22].mxu1 }
 0x20e   : > { %831 = vst.msk [vmem:[%s1424_s4 + $0xb8] sm:$0xff] %vm807_vm1, %v1103_v2  ;;  %v798_v3 = vpop.f32.mrb[23].mxu1 }
 0x20f   : > { %830 = vst.msk [vmem:[%s1424_s4 + $0xb0] sm:$0xff] %vm807_vm1, %v798_v3 }
 0x210 PF: > { %p13_p8 = scmp.ge.s32.totalorder %s1272_s17, 4   ;;  %s1494_s12 = smov %s1219_s13 }
 0x211   : > { %s1495_s13 = smov %s1223_s14  ;;  %s1496_s14 = smov %s1282_s20 }
 0x212   : > { %s1497_s15 = smov %s1272_s17  ;;  %15 = sbr.rel (!%p13_p8) target bundleno = 3 (0x3), region = 72 }
 0x219   :  { %854 = vsyncpa [#allocation3], 1 }
 0x21a   :  { %856 = vsyncpa [#allocation3 + $0x1], 1 }

</bundles_post_ra>
